<compile_context>
chip_gen: v5e
topology: v5e:2x2
jax: 0.10.0
libtpu: 0.0.40
codegen_flags: <defaults>
</compile_context>

<pallas_src>
import jax
import jax.numpy as jnp
import numpy as np
from jax import lax
from jax.experimental import pallas as pl
from jax.experimental.pallas import tpu as pltpu


def _round_up(x, m):
    return (x + m - 1) // m * m


_NEG_INF = -1e30
_MIB = 1024 * 1024


def _mosaic_params(dimension_semantics, vmem_bytes):
    # Explicit scoped-VMEM limit: defaults are 16 MiB (v5e) / 32 MiB (v6e, v7x); large lane
    # tiles need more.  The tile/fuse heuristics below keep real demand well under v7x's
    # 64 MiB physical VMEM, so the clamp never exceeds what the hardware can hold.
    limit = int(min(max(vmem_bytes, 32 * _MIB), 96 * _MIB))
    return pltpu.CompilerParams(dimension_semantics=dimension_semantics,
                                vmem_limit_bytes=limit)


def _softmax_plus_identity(logits, c, c_pad):
    """Row softmax with padded channel columns masked out, then + I (folds the residual)."""
    col = lax.broadcasted_iota(jnp.int32, logits.shape, 1)
    if c_pad != c:
        logits = jnp.where(col < c, logits, _NEG_INF)
    m = jnp.max(logits, axis=-1, keepdims=True)
    e = jnp.exp(logits - m)
    s = jnp.sum(e, axis=-1, keepdims=True)
    # EUP reciprocal seed (separate issue slot) + one Newton step keeps f32 accuracy.
    inv = pl.reciprocal(s, approx=True)
    inv = inv * (2.0 - s * inv)
    att = e * inv
    row = lax.broadcasted_iota(jnp.int32, logits.shape, 0)
    return att + jnp.where(row == col, 1.0, 0.0)


def _pad_correction(b12_f32, c_pad, n_pad_pixels):
    """Exact logits contribution of zero-padded pixels: n_pad * outer(b1, b2)."""
    b1 = b12_f32[:c_pad, :]   # (c_pad, 1)
    b2 = b12_f32[c_pad:, :]   # (c_pad, 1)
    outer = lax.dot_general(b1, b2, dimension_numbers=(((1,), (1,)), ((), ())),
                            preferred_element_type=jnp.float32)
    return float(n_pad_pixels) * outer


# ----------------------------------------------------------------------------------
# Fused single-pass kernel (one batch element resident in VMEM).
# ----------------------------------------------------------------------------------
def _make_fused_kernel(c, c_pad, hw, hw_pad, bf16_ops):
    n_extra = hw_pad - hw
    op_dt = jnp.bfloat16 if bf16_ops else jnp.float32

    def kernel(x_ref, w12_ref, b12_ref, o_ref):
        # x_ref: (c_pad, hw_pad) -- whole (padded) image of one batch element.
        x = x_ref[...].astype(jnp.float32)
        b12 = b12_ref[...].astype(jnp.float32)
        # Both 1x1 convs in one MXU matmul: (2*c_pad, c_pad) @ (c_pad, hw_pad).
        qk = jnp.dot(w12_ref[...].astype(op_dt), x.astype(op_dt),
                     preferred_element_type=jnp.float32) + b12
        q = qk[:c_pad, :]
        k = qk[c_pad:, :]
        # q @ k^T without materializing the transpose (contract on the lane axis).
        logits = lax.dot_general(q, k, dimension_numbers=(((1,), (1,)), ((), ())),
                                 preferred_element_type=jnp.float32)
        if n_extra:
            logits = logits - _pad_correction(b12, c_pad, n_extra)
        att = _softmax_plus_identity(logits, c, c_pad)
        # x is still resident: no second HBM read.
        o_ref[...] = jnp.dot(att.astype(op_dt), x.astype(op_dt),
                             preferred_element_type=jnp.float32).astype(o_ref.dtype)

    return kernel


# ----------------------------------------------------------------------------------
# Two-pass streaming kernels (image-size independent VMEM) for large images.
# ----------------------------------------------------------------------------------
def _make_logits_kernel(c, c_pad, hw, hw_pad, bf16_ops):
    n_extra = hw_pad - hw
    op_dt = jnp.bfloat16 if bf16_ops else jnp.float32

    def kernel(x_ref, w12_ref, b12_ref, att_ref):
        # att_ref's block index is constant over the t axis -> resident accumulator.
        t = pl.program_id(1)

        @pl.when(t == 0)
        def _():
            att_ref[...] = jnp.zeros_like(att_ref)

        x = x_ref[...]
        b12 = b12_ref[...].astype(jnp.float32)
        qk = jnp.dot(w12_ref[...].astype(op_dt), x.astype(op_dt),
                     preferred_element_type=jnp.float32) + b12
        q = qk[:c_pad, :]
        k = qk[c_pad:, :]
        att_ref[...] += lax.dot_general(q, k, dimension_numbers=(((1,), (1,)), ((), ())),
                                        preferred_element_type=jnp.float32)

        @pl.when(t == pl.num_programs(1) - 1)
        def _():
            logits = att_ref[...]
            if n_extra:
                # Zero-padded pixels were not masked per tile (saves VPU work every step);
                # their exact contribution is removed once here.
                logits = logits - _pad_correction(b12, c_pad, n_extra)
            att_ref[...] = _softmax_plus_identity(logits, c, c_pad)

    return kernel


def _make_apply_kernel(bf16_ops):
    op_dt = jnp.bfloat16 if bf16_ops else jnp.float32

    def kernel(att_ref, x_ref, o_ref):
        # out_tile = (A + I) @ x_tile  (residual already folded into A).
        o_ref[...] = jnp.dot(att_ref[...].astype(op_dt), x_ref[...].astype(op_dt),
                             preferred_element_type=jnp.float32).astype(o_ref.dtype)

    return kernel


# ----------------------------------------------------------------------------------
# Wrapper
# ----------------------------------------------------------------------------------
def attention_forward(x, w1, b1, w2, b2, *, hw_tile=2048, fuse_slab_bytes=3 * _MIB,
                      bf16_matmul=False):
    """x: (B, C, H, W).  1x1-conv weights w*: (C, C), biases b*: (C,)."""
    B, C, H, W = x.shape
    HW = H * W

    c_pad = _round_up(max(C, 8), 8)           # sublane-dense channels
    hw_lane = _round_up(HW, 128)              # lane-dense pixels
    itemsize = jnp.dtype(x.dtype).itemsize

    x_flat = x.reshape(B, C, HW)

    # Fused + channel-padded conv parameters: [w1; w2] -> (2*c_pad, c_pad), [b1; b2].
    w12 = jnp.zeros((2 * c_pad, c_pad), x.dtype)
    w12 = w12.at[:C, :C].set(w1).at[c_pad:c_pad + C, :C].set(w2)
    b12 = jnp.zeros((2 * c_pad, 1), x.dtype)
    b12 = b12.at[:C, 0].set(b1).at[c_pad:c_pad + C, 0].set(b2)

    slab_bytes = c_pad * hw_lane * 4          # f32 working copy of one batch element

    if slab_bytes <= fuse_slab_bytes:
        # ---- Single fused pass: one batch element per grid step stays resident --------
        hw_pad = hw_lane
        x_p = jnp.pad(x_flat, ((0, 0), (0, c_pad - C), (0, hw_pad - HW)))
        vmem_need = 8 * slab_bytes + 8 * c_pad * c_pad * 4
        out_p = pl.pallas_call(
            _make_fused_kernel(C, c_pad, HW, hw_pad, bf16_matmul),
            out_shape=jax.ShapeDtypeStruct((B, c_pad, hw_pad), x.dtype),
            grid=(B,),
            in_specs=[
                pl.BlockSpec((pl.Squeezed(), c_pad, hw_pad), lambda b: (b, 0, 0)),
                pl.BlockSpec((2 * c_pad, c_pad), lambda b: (0, 0)),
                pl.BlockSpec((2 * c_pad, 1), lambda b: (0, 0)),
            ],
            out_specs=pl.BlockSpec((pl.Squeezed(), c_pad, hw_pad), lambda b: (b, 0, 0)),
            compiler_params=_mosaic_params(("parallel",), vmem_need),
        )(x_p, w12, b12)
        return out_p[:, :C, :HW].reshape(B, C, H, W)

    # ---- Two streaming passes over lane tiles of x --------------------------------
    max_tile = max(_round_up(hw_tile, 128), 128)
    n_t = pl.cdiv(hw_lane, max_tile)
    t_hw = _round_up(pl.cdiv(hw_lane, n_t), 128)   # minimal-overshoot 128-aligned tile
    hw_pad = n_t * t_hw
    x_p = jnp.pad(x_flat, ((0, 0), (0, c_pad - C), (0, hw_pad - HW)))

    # Pass 1: per-batch (A + I) matrices.  (v7x B==1 leaves one TC idle here; a core-split
    # of the t reduction is the next lever but is not implemented.)
    vmem_p1 = (2 * c_pad * t_hw * itemsize * 2          # double-buffered x tiles
               + 2 * (2 * c_pad) * c_pad * 4            # w12
               + 2 * c_pad * c_pad * 4                  # att output block
               + 2 * (2 * c_pad) * t_hw * 4)            # qk intermediate headroom
    att = pl.pallas_call(
        _make_logits_kernel(C, c_pad, HW, hw_pad, bf16_matmul),
        out_shape=jax.ShapeDtypeStruct((B, c_pad, c_pad), jnp.float32),
        grid=(B, n_t),
        in_specs=[
            pl.BlockSpec((pl.Squeezed(), c_pad, t_hw), lambda b, t: (b, 0, t)),
            pl.BlockSpec((2 * c_pad, c_pad), lambda b, t: (0, 0)),
            pl.BlockSpec((2 * c_pad, 1), lambda b, t: (0, 0)),
        ],
        out_specs=pl.BlockSpec((pl.Squeezed(), c_pad, c_pad), lambda b, t: (b, 0, 0)),
        compiler_params=_mosaic_params(("parallel", "arbitrary"), vmem_p1),
    )(x_p, w12, b12)

    # Pass 2: out = (A + I) @ x, streamed over lane-dense HW tiles (both axes parallel).
    vmem_p2 = (2 * c_pad * c_pad * 4
               + 2 * c_pad * t_hw * itemsize * 2        # x in + out, double-buffered
               + 2 * c_pad * t_hw * 4)                  # f32 intermediate headroom
    out_p = pl.pallas_call(
        _make_apply_kernel(bf16_matmul),
        out_shape=jax.ShapeDtypeStruct((B, c_pad, hw_pad), x.dtype),
        grid=(B, n_t),
        in_specs=[
            pl.BlockSpec((pl.Squeezed(), c_pad, c_pad), lambda b, t: (b, 0, 0)),
            pl.BlockSpec((pl.Squeezed(), c_pad, t_hw), lambda b, t: (b, 0, t)),
        ],
        out_specs=pl.BlockSpec((pl.Squeezed(), c_pad, t_hw), lambda b, t: (b, 0, t)),
        compiler_params=_mosaic_params(("parallel", "parallel"), vmem_p2),
    )(att, x_p)

    return out_p[:, :C, :HW].reshape(B, C, H, W)


def attention_reference(x, w1, b1, w2, b2):
    """Plain-JAX reference mirroring the PyTorch forward."""
    B, C, H, W = x.shape
    HW = H * W
    xf = x.reshape(B, C, HW)
    q = jnp.einsum("oc,bcp->bop", w1, xf) + b1[None, :, None]
    k = jnp.einsum("oc,bcp->bop", w2, xf) + b2[None, :, None]
    att = jnp.einsum("bip,bjp->bij", q, k)
    att = jax.nn.softmax(att, axis=-1)
    av = jnp.einsum("bij,bjp->bip", att, xf)
    return (xf + av).reshape(B, C, H, W)


if __name__ == "__main__":
    # Small shapes consistent with the module: in_channels == out_channels (required
    # by the residual add / view in the PyTorch forward).
    B, C, H, W = 2, 4, 16, 16

    key = jax.random.PRNGKey(0)
    kx, kw1, kb1, kw2, kb2 = jax.random.split(key, 5)

    x = jax.random.normal(kx, (B, C, H, W), dtype=jnp.float32)
    bound = 1.0 / np.sqrt(C)
    w1 = jax.random.uniform(kw1, (C, C), minval=-bound, maxval=bound, dtype=jnp.float32)
    b1 = jax.random.uniform(kb1, (C,), minval=-bound, maxval=bound, dtype=jnp.float32)
    w2 = jax.random.uniform(kw2, (C, C), minval=-bound, maxval=bound, dtype=jnp.float32)
    b2 = jax.random.uniform(kb2, (C,), minval=-bound, maxval=bound, dtype=jnp.float32)

    out = attention_forward(x, w1, b1, w2, b2)
    out = jax.block_until_ready(out)

    ref = attention_reference(x, w1, b1, w2, b2)
    # f32 matmuls throughout; only the Newton-refined EUP reciprocal and summation-order
    # differences separate us from the reference.
    np.testing.assert_allclose(np.asarray(out), np.asarray(ref), rtol=1e-4, atol=1e-4)

    print("KERNEL_OK")
</pallas_src>

<mosaic_0001>
module attributes {stable_mosaic.version = 11 : i64} {
  func.func @kernel(%arg0: i32, %arg1: memref<1x8x256xf32, #tpu.memory_space<vmem>>, %arg2: memref<16x8xf32, #tpu.memory_space<vmem>>, %arg3: memref<16x1xf32, #tpu.memory_space<vmem>>, %arg4: memref<1x8x256xf32, #tpu.memory_space<vmem>>) attributes {dimension_semantics = [#tpu.dimension_semantics<parallel>], iteration_bounds = array<i64: 2>, scalar_prefetch = 0 : i64, scratch_operands = 0 : i64, tpu.core_type = #tpu.core_type<tc>, window_params = [{transform_indices = @transform_0, window_bounds = array<i64: 1, 8, 256>}, {pipeline_mode = #tpu.pipeline_mode<synchronous>, transform_indices = @transform_1, window_bounds = array<i64: 16, 8>}, {pipeline_mode = #tpu.pipeline_mode<synchronous>, transform_indices = @transform_2, window_bounds = array<i64: 16, 1>}, {transform_indices = @transform_3, window_bounds = array<i64: 1, 8, 256>}]} {
    %c0 = arith.constant 0 : index
    %c0_0 = arith.constant 0 : index
    %c0_1 = arith.constant 0 : index
    %0 = vector.load %arg1[%c0, %c0_0, %c0_1] : memref<1x8x256xf32, #tpu.memory_space<vmem>>, vector<1x8x256xf32>
    %1 = vector.shape_cast %0 : vector<1x8x256xf32> to vector<8x256xf32>
    %c0_2 = arith.constant 0 : index
    %c0_3 = arith.constant 0 : index
    %2 = vector.load %arg3[%c0_2, %c0_3] : memref<16x1xf32, #tpu.memory_space<vmem>>, vector<16x1xf32>
    %c0_4 = arith.constant 0 : index
    %c0_5 = arith.constant 0 : index
    %3 = vector.load %arg2[%c0_4, %c0_5] : memref<16x8xf32, #tpu.memory_space<vmem>>, vector<16x8xf32>
    %cst = arith.constant dense<0.000000e+00> : vector<16x256xf32>
    %4 = tpu.matmul %3, %1, %cst {dimension_numbers = #tpu.dot_dimension_numbers<[1], [0], [0], [1], [0, 0, 1, 1], [], []>} : vector<16x8xf32>, vector<8x256xf32>, vector<16x256xf32> -> vector<16x256xf32>
    %5 = vector.broadcast %2 : vector<16x1xf32> to vector<16x256xf32>
    %6 = arith.addf %4, %5 : vector<16x256xf32>
    %7 = vector.extract_strided_slice %6 {offsets = [0, 0], sizes = [8, 256], strides = [1, 1]} : vector<16x256xf32> to vector<8x256xf32>
    %8 = vector.extract_strided_slice %6 {offsets = [8, 0], sizes = [8, 256], strides = [1, 1]} : vector<16x256xf32> to vector<8x256xf32>
    %cst_6 = arith.constant dense<0.000000e+00> : vector<8x8xf32>
    %9 = tpu.matmul %7, %8, %cst_6 {dimension_numbers = #tpu.dot_dimension_numbers<[1], [1], [0], [0], [0, 0, 1, 0], [], []>} : vector<8x256xf32>, vector<8x256xf32>, vector<8x8xf32> -> vector<8x8xf32>
    %10 = tpu.iota {dimensions = array<i32: 1>} : vector<8x8xi32>
    %c4_i32 = arith.constant 4 : i32
    %11 = vector.broadcast %c4_i32 : i32 to vector<8x8xi32>
    %12 = arith.cmpi slt, %10, %11 : vector<8x8xi32>
    %cst_7 = arith.constant -1.000000e+30 : f32
    %13 = vector.broadcast %cst_7 : f32 to vector<8x8xf32>
    %14 = arith.select %12, %9, %13 : vector<8x8xi1>, vector<8x8xf32>
    %cst_8 = arith.constant dense<0xFF800000> : vector<8xf32>
    %15 = vector.multi_reduction <maximumf>, %14, %cst_8 [1] : vector<8x8xf32> to vector<8xf32>
    %16 = vector.shape_cast %15 : vector<8xf32> to vector<8x1xf32>
    %17 = vector.broadcast %16 : vector<8x1xf32> to vector<8x8xf32>
    %18 = arith.subf %14, %17 : vector<8x8xf32>
    %19 = math.exp %18 : vector<8x8xf32>
    %cst_9 = arith.constant dense<0.000000e+00> : vector<8xf32>
    %20 = vector.multi_reduction <add>, %19, %cst_9 [1] : vector<8x8xf32> to vector<8xf32>
    %21 = vector.shape_cast %20 : vector<8xf32> to vector<8x1xf32>
    %22 = tpu.reciprocal %21 {approx = true} : vector<8x1xf32> -> vector<8x1xf32>
    %23 = arith.mulf %21, %22 : vector<8x1xf32>
    %cst_10 = arith.constant 2.000000e+00 : f32
    %24 = vector.broadcast %cst_10 : f32 to vector<8x1xf32>
    %25 = arith.subf %24, %23 : vector<8x1xf32>
    %26 = arith.mulf %22, %25 : vector<8x1xf32>
    %27 = vector.broadcast %26 : vector<8x1xf32> to vector<8x8xf32>
    %28 = arith.mulf %19, %27 : vector<8x8xf32>
    %29 = tpu.iota {dimensions = array<i32: 0>} : vector<8x8xi32>
    %30 = arith.cmpi eq, %29, %10 : vector<8x8xi32>
    %cst_11 = arith.constant 1.000000e+00 : f32
    %cst_12 = arith.constant 0.000000e+00 : f32
    %31 = vector.broadcast %cst_11 : f32 to vector<8x8xf32>
    %32 = vector.broadcast %cst_12 : f32 to vector<8x8xf32>
    %33 = arith.select %30, %31, %32 : vector<8x8xi1>, vector<8x8xf32>
    %34 = arith.addf %28, %33 : vector<8x8xf32>
    %cst_13 = arith.constant dense<0.000000e+00> : vector<8x256xf32>
    %35 = tpu.matmul %34, %1, %cst_13 {dimension_numbers = #tpu.dot_dimension_numbers<[1], [0], [0], [1], [0, 0, 1, 1], [], []>} : vector<8x8xf32>, vector<8x256xf32>, vector<8x256xf32> -> vector<8x256xf32>
    %c0_14 = arith.constant 0 : index
    %c0_15 = arith.constant 0 : index
    %c0_16 = arith.constant 0 : index
    %36 = vector.load %arg4[%c0_14, %c0_15, %c0_16] : memref<1x8x256xf32, #tpu.memory_space<vmem>>, vector<1x8x256xf32>
    %37 = vector.shape_cast %36 : vector<1x8x256xf32> to vector<8x256xf32>
    %38 = vector.shape_cast %35 : vector<8x256xf32> to vector<1x8x256xf32>
    tpu.vector_store %arg4[%c0_14, %c0_15, %c0_16], %38 {strides = array<i32>} : memref<1x8x256xf32, #tpu.memory_space<vmem>>, vector<1x8x256xf32>,
    return
  }
  func.func @transform_0(%arg0: i32) -> (i32, i32, i32) {
    %c0_i32 = arith.constant 0 : i32
    %c0_i32_0 = arith.constant 0 : i32
    %c0_i32_1 = arith.constant 0 : i32
    return %arg0, %c0_i32, %c0_i32_0 : i32, i32, i32
  }
  func.func @transform_1(%arg0: i32) -> (i32, i32) {
    %c0_i32 = arith.constant 0 : i32
    %c0_i32_0 = arith.constant 0 : i32
    %c0_i32_1 = arith.constant 0 : i32
    return %c0_i32, %c0_i32_0 : i32, i32
  }
  func.func @transform_2(%arg0: i32) -> (i32, i32) {
    %c0_i32 = arith.constant 0 : i32
    %c0_i32_0 = arith.constant 0 : i32
    %c0_i32_1 = arith.constant 0 : i32
    return %c0_i32, %c0_i32_0 : i32, i32
  }
  func.func @transform_3(%arg0: i32) -> (i32, i32, i32) {
    %c0_i32 = arith.constant 0 : i32
    %c0_i32_0 = arith.constant 0 : i32
    %c0_i32_1 = arith.constant 0 : i32
    return %arg0, %c0_i32, %c0_i32_0 : i32, i32, i32
  }
}

</mosaic_0001>

<bundles_post_ra>
// kernel: tpu_custom_call.1
= control target key start
LH: loop header
LB: loop body
LE: loop exit
PB: predicated region body
PF: predicated region fallthrough
CT: control target
= control target key end

     0   :  { %8 = vsyncpa [#allocation3], 0  ;;  %s680_s0 = inlined_call_operand.vmem [shape: f32[2,8,256], index: 0, kind: input, shape index: {}]   ;;  %s681_s1 = inlined_call_operand.vmem [shape: f32[16,8], index: 1, kind: input, shape index: {}]   ;;  %s682_s2 = inlined_call_operand.vmem [shape: f32[16,1], index: 2, kind: input, shape index: {}]   ;;  %s683_s3 = inlined_call_operand.hbm [shape: f32[2,8,256], index: 3, kind: output, shape index: {}]  }
   0x1   :  { %10 = vsyncpa [#allocation3 + $0x1], 0  ;;  %s574_s12 = smov 0   ;;  %s576_s13 = smov 0  }
   0x2   :  { %s578_s14 = smov 0   ;;  %s580_s15 = smov 0  }
   0x3 LB: > { %s595_s16 = sadd.s32 4294967295, %s550_s15   ;;  %s422_s17 = sadd.s32 4294967294, %s550_s15   ;;  %s550_s15 = sphi %s580_s15, %s689_s15   ;;  %s546_s14 = sphi %s578_s14, %s688_s14   ;;  %s542_s13 = sphi %s576_s13, %s687_s13   ;;  %s538_s12 = sphi %s574_s12, %s686_s12  }
   0x4   : > { %s599_s18 = sadd.s32 1, %s550_s15   ;;  %s91_s19 = sadd.s32 1, %s546_s14 }
   0x5   : > { %s88_s20 = ssub.s32 %s550_s15, %s599_s18  ;;  %p101_p0 = scmp.ne.s32.totalorder %s546_s14, %s542_s13 }
   0x6   : > { %p89_p1 = scmp.eq.s32.totalorder %s88_s20, 0  ;;  %p102_p2 = scmp.eq.s32.totalorder %s595_s16, 1 }
   0x7   : > { %p107_p3 = scmp.ne.s32.totalorder %s542_s13, %s538_s12  ;;  %p108_p4 = scmp.eq.s32.totalorder %s422_s17, 1 }
   0x8   : > { %s610_s21 = scalar_select %p89_p1, %s546_s14, %s91_s19  }
   0x9   : > { %p612_p5 = por %p102_p2, %p101_p0  ;;  %p616_p6 = por %p108_p4, %p107_p3 }
   0xa   : > { %p425_p7 = scmp.ge.s32.totalorder %s550_s15, 1  ;;  %p140_p8 = scmp.lt.s32.totalorder %s550_s15, 3 }
   0xc   : > { %p141_p9 = pnand %p425_p7, %p140_p8 }
   0xd   : > { %p164_p10 = scmp.lt.s32.totalorder (!%p141_p9), %s595_s16, 1  ;;  %s161_s10 = sand.u32 (!%p141_p9), 1, %s542_s13  }
   0xe   : > { %144 = sbr.rel (%p141_p9) target bundleno = 697 (0x2b9), region = 32  ;;  %s426_s11 = sshll.u32 (!%p141_p9), %s161_s10, 4 }
   0xf   : > { %s441_s17 = sshll.u32 (!%p141_p9), %s595_s16, 4  ;;  %s163_s25 = scalar_lea.vmem (!%p141_p9), [#allocation2], %s426_s11 }
  0x10   : > { %s358_s24 = scalar_lea.hbm (!%p141_p9), %s683_s3, %s441_s17  ;;  %s347_s28 = scalar_lea.sflag (!%p141_p9), [#allocation3], %s161_s10 }
  0x11   : > { %s508_s5 = scalar_lea.hbm (!%p141_p9), %s683_s3, 32 }
  0x13   : > { %v172_v0 = vld [vmem:[%s682_s2 + $0x8] sm:$0xff]  ;;  %v552_v1 = vmov 0   ;;  %s165_s26 = scalar_select %p164_p10, %s595_s16, 1  ;;  %v173_v2 = vld [vmem:[%s681_s1] sm:$0xff]  ;;  %vm185_vm0 = vcmask 64512   ;;  %v278_v17 = vlaneseq  ;;  %v553_v35 = vmov 0.0  }
  0x14   : > { %483 = vset.pattern.permute.xlu0 %v552_v1  ;;  %v171_v5 = vld [vmem:[%s682_s2] sm:$0xff]  ;;  %v174_v6 = vld [vmem:[%s681_s1 + $0x8] sm:$0xff] }
  0x15   : > { %182 = vperm.xlu0 %483, %v172_v0   ;;  %s440_s27 = sshll.u32 %s165_s26, 4  ;;  %v279_v18 = vand.u32 127, %v278_v17  ;;  %v297_v19 = vshrl.u32 %v278_v17, 7  ;;  %s360_s26 = sshll.u32 %s163_s25, 4  ;;  %s361_s26 = int_to_ptr.vmem [resolvable:$true] %s360_s26 }
  0x16   : > { %s168_s30 = scalar_lea.vmem %s680_s0, %s440_s27  ;;  %s362_s27 = sshll.u32 %s358_s24, 4  ;;  %s363_s27 = int_to_ptr.hbm [resolvable:$true] %s362_s27 }
  0x17   : > { %v169_v3 = vld [vmem:[%s168_s30] sm:$0xff]  ;;  %v170_v4 = vld [vmem:[%s168_s30 + $0x8] sm:$0xff]  ;;  %vm298_vm1 = vcmp.eq.s32.totalorder %v297_v19, %v279_v18  ;;  %vm280_vm2 = vcmp.lt.s32.totalorder %v279_v18, 4  ;;  %s502_s29 = sshra.s32 %s363_s27, 4  ;;  %s503_s29 = int_to_ptr.hbm [resolvable:$true] %s502_s29 }
  0x18   : > { %207 = vmatpush.msra.mxu0 %v169_v3  ;;  %230 = vmatpush.msra.mxu1 %v170_v4  ;;  %v299_v36 = vsel %vm298_vm1, 1.0, %v553_v35  ;;  %s504_s30 = scalar_lea.hbm %s503_s29, 16  ;;  %p509_p0 = scmp.lt.s32.totalorder %s503_s29, %s683_s3 }
  0x19   : > { %429 = vmatmul.msk.f32.vlgmr.msra.gmra.mxu0 %vm185_vm0, %v173_v2  ;;  %431 = vmatmul.msk.f32.vlgmr.msra.gmra.mxu1 %vm185_vm0, %v173_v2  ;;  %p505_p11 = scmp.ne.s32.totalorder %s503_s29, %s504_s30  ;;  %p510_p1 = scmp.lt.s32.totalorder %s508_s5, %s504_s30 }
  0x1b   : > { %p506_p12 = pnand %p505_p11, %p612_p5  ;;  %p511_p2 = por %p510_p1, %p509_p0 }
  0x1d   : > { %177 = vperm.xlu0 %483, %v171_v5   ;;  %p507_p13 = pneg %p506_p12 }
  0x1f   : > { %p512_p3 = pnand %p511_p2, %p507_p13 }
  0x21   : > { %430 = vmatmul.msk.f32.gmra.mxu0 %vm185_vm0, %v174_v6  ;;  %432 = vmatmul.msk.f32.gmra.mxu1 %vm185_vm0, %v174_v6 }
  0x87   : > { %v183_v7 = vpop.permute.xlu0 %182 }
  0x8f   : > { %v178_v12 = vpop.permute.xlu0 %177 }
  0x96   : > { %v209_v8 = vpop.f32.mrf.mxu0  ;;  %v232_v9 = vpop.f32.mrf.mxu1 }
  0x97   : > { %v210_v15 = vadd.f32 %v209_v8, %v178_v12  ;;  %v233_v16 = vadd.f32 %v232_v9, %v178_v12 }
  0x9e   : > { %v212_v10 = vpop.f32.mrf.mxu0  ;;  %v235_v11 = vpop.f32.mrf.mxu1 }
  0x9f   : > { %v213_v13 = vadd.f32 %v212_v10, %v183_v7  ;;  %v236_v14 = vadd.f32 %v235_v11, %v183_v7 }
  0xa1   : > { %253 = vmatpush.xpose.msra.mxu2 %v213_v13  ;;  %273 = vmatpush.xpose.msra.mxu3 %v236_v14 }
  0xa4   : > { %254 = vmatmul.f32.vlgmr.msra.gmra.mxu2 %v210_v15  ;;  %274 = vmatmul.f32.vlgmr.msra.gmra.mxu3 %v233_v16 }
  0xa5   : > { %319 = vmatpush.msrb.mxu2 %v169_v3  ;;  %339 = vmatpush.msrb.mxu3 %v170_v4 }
 0x127   : > { %v255_v20 = vpop.f32.mrf.mxu2  ;;  %v275_v21 = vpop.f32.mrf.mxu3 }
 0x128   : > { %v276_v22 = vadd.f32 %v275_v21, %v255_v20 }
 0x12a   : > { %v281_v23 = vsel %vm280_vm2, %v276_v22, -1e+30 }
 0x12b   : > { %v282_v24 = vsel %vm185_vm0, %v281_v23, -inf }
 0x12c   : > { %283 = vmax.xlane.f32.xlu1 %v282_v24 }
 0x19f   : > { %v284_v25 = vpop.xlane.xlu1 %283 }
 0x1a0   : > { %v285_v26 = vsub.f32 %v281_v23, %v284_v25 }
 0x1a2   : > { %v286_v27 = vmul.f32 1.442695, %v285_v26 }
 0x1a4   : > { %484 = vpow2.f32 %v286_v27 }
 0x1aa   : > { %v485_v28 = vpop.eup %484 }
 0x1ab   : > { %v288_v29 = vsel %vm185_vm0, %v485_v28, 0.0 }
 0x1ac   : > { %289 = vadd.xlane.f32.xlu1 %v288_v29 }
 0x21f   : > { %v290_v30 = vpop.xlane.xlu1 %289 }
 0x220   : > { %486 = vrcp.f32 %v290_v30 }
 0x226   : > { %v487_v31 = vpop.eup %486 }
 0x227   : > { %v292_v32 = vmul.f32 %v487_v31, %v290_v30 }
 0x229   : > { %v293_v33 = vsub.f32 2.0, %v292_v32 }
 0x22b   : > { %v294_v34 = vmul.f32 %v487_v31, %v293_v33 }
 0x22d   : > { %v295_v37 = vmul.f32 %v485_v28, %v294_v34 }
 0x22f   : > { %v300_v38 = vadd.f32 %v299_v36, %v295_v37 }
 0x231   : > { %433 = vmatmul.msk.f32.vlgmr.msrb.gmra.mxu2 %vm185_vm0, %v300_v38  ;;  %434 = vmatmul.msk.f32.vlgmr.msrb.gmra.mxu3 %vm185_vm0, %v300_v38 }
 0x2b4   : > { %v321_v39 = vpop.f32.mrf.mxu2  ;;  %v341_v40 = vpop.f32.mrf.mxu3 }
 0x2b5   : > { %344 = vst [vmem:[%s163_s25] sm:$0xff] %v321_v39 }
 0x2b6   : > { %345 = vst [vmem:[%s163_s25 + $0x8] sm:$0xff] %v341_v40 }
 0x2b7   : > { %515 = shalt.err (!%p512_p3)
}
 0x2b8   : > { %442 = dma.vmem_to_hbm [thread:$0]  (%p612_p5), %s361_s26, 256, %s363_s27, %s347_s28  }
 0x2b9 PF: > { %p448_p4 = scmp.ge.s32.totalorder %s550_s15, 2  ;;  %s374_s8 = sand.u32 1, %s538_s12  }
 0x2ba   : > { %s375_s9 = scalar_lea.sflag [#allocation3], %s374_s8 }
 0x2bb   : > { %p445_p7 = pnand %p448_p4, %p616_p6 }
 0x2bd   : > { %p446_p8 = pneg %p445_p7 }
 0x2bf   : > { %533 = dma.done.wait (%p446_p8), %s375_s9, 256  }
 0x2c0   : > { %535 = vsyncadd (%p446_p8), %s375_s9, 4294967040  ;;  %p13_p9 = scmp.ge.s32.totalorder %s599_s18, 4   ;;  %s686_s12 = smov %s542_s13 }
 0x2c1   : > { %s687_s13 = smov %s546_s14  ;;  %s688_s14 = smov %s610_s21 }
 0x2c2   : > { %s689_s15 = smov %s599_s18  ;;  %15 = sbr.rel (!%p13_p9) target bundleno = 3 (0x3), region = 67 }
 0x2c7   :  { %381 = vsyncpa [#allocation3], 1 }
 0x2c8   :  { %383 = vsyncpa [#allocation3 + $0x1], 1 }

</bundles_post_ra>
